<compile_context>
chip_gen: v6e
topology: v6e:2x2x1
jax: 0.10.0
libtpu: 0.0.40
codegen_flags: <defaults>
</compile_context>

<pallas_src>
import functools

import jax
import jax.numpy as jnp
from jax.experimental import pallas as pl
from jax.experimental.pallas import tpu as pltpu


# --------------------------------------------------------------------------
# Kernels
# --------------------------------------------------------------------------
def _masked_readout_kernel(seq_ref, msk_ref, out_ref, den_sc):
    n = pl.program_id(0)

    @pl.when(n == 0)
    def _():
        out_ref[...] = jnp.zeros_like(out_ref)
        den_sc[...] = jnp.zeros_like(den_sc)

    seq = seq_ref[...]                               # (B, block_n, D)
    msk = msk_ref[...]                               # (B, block_n, 1)
    out_ref[...] += jnp.sum(seq * msk, axis=1)       # numerator accum (B, D)
    den_sc[...] += jnp.sum(msk, axis=1)              # denominator accum (B, 1)

    @pl.when(n == pl.num_programs(0) - 1)
    def _():
        out_ref[...] = out_ref[...] / den_sc[...]


def _mean_readout_kernel(seq_ref, out_ref, *, inv_n):
    n = pl.program_id(0)

    @pl.when(n == 0)
    def _():
        out_ref[...] = jnp.zeros_like(out_ref)

    out_ref[...] += jnp.sum(seq_ref[...], axis=1)    # (B, D)

    @pl.when(n == pl.num_programs(0) - 1)
    def _():
        out_ref[...] = out_ref[...] * inv_n


# --------------------------------------------------------------------------
# Wrapper (Readout.forward)
# --------------------------------------------------------------------------
def readout_pallas(seq, msk=None, *, block_n=None):
    """seq: (B, N, D) f32, msk: None or (B, N) / (B, N, 1) -> (B, D) f32."""
    B, N, D = seq.shape
    if block_n is None:
        block_n = N
    assert N % block_n == 0, "block_n must divide N (pad the input otherwise)"
    grid = (N // block_n,)

    out_shape = jax.ShapeDtypeStruct((B, D), jnp.float32)
    # Constant index_map: the output block is the VMEM-resident accumulator,
    # written back to HBM once at the end (lane-dense store).
    out_spec = pl.BlockSpec((B, D), lambda n: (0, 0))
    seq_spec = pl.BlockSpec((B, block_n, D), lambda n: (0, n, 0))
    cparams = pltpu.CompilerParams(dimension_semantics=("arbitrary",))

    if msk is None:
        kernel = functools.partial(_mean_readout_kernel, inv_n=float(1.0 / N))
        grid_spec = pltpu.PrefetchScalarGridSpec(
            num_scalar_prefetch=0,
            grid=grid,
            in_specs=[seq_spec],
            out_specs=out_spec,
        )
        return pl.pallas_call(
            kernel,
            out_shape=out_shape,
            grid_spec=grid_spec,
            compiler_params=cparams,
        )(seq)

    if msk.ndim == 2:
        msk = msk[..., None]
    msk = msk.astype(jnp.float32)

    grid_spec = pltpu.PrefetchScalarGridSpec(
        num_scalar_prefetch=0,
        grid=grid,
        in_specs=[
            seq_spec,
            pl.BlockSpec((B, block_n, 1), lambda n: (0, n, 0)),
        ],
        out_specs=out_spec,
        scratch_shapes=[pltpu.VMEM((B, 1), jnp.float32)],
    )
    return pl.pallas_call(
        _masked_readout_kernel,
        out_shape=out_shape,
        grid_spec=grid_spec,
        compiler_params=cparams,
    )(seq, msk)


# --------------------------------------------------------------------------
# Test
# --------------------------------------------------------------------------
if __name__ == "__main__":
    B, N, D = 2, 16, 32            # batch=2, seq/nodes=16, hidden=32
    key = jax.random.PRNGKey(0)
    k_seq, k_msk = jax.random.split(key)

    seq = jax.random.normal(k_seq, (B, N, D), jnp.float32)
    msk = (jax.random.uniform(k_msk, (B, N, 1)) > 0.3).astype(jnp.float32)
    msk = msk.at[:, 0, :].set(1.0)   # guarantee nonzero mask sums (no div by 0)

    # masked path, chunked reduction over N (exercises the accumulator grid)
    out_masked = readout_pallas(seq, msk, block_n=8)
    # msk-is-None path (plain mean over axis 1), single grid step
    out_mean = readout_pallas(seq, None)
    jax.block_until_ready((out_masked, out_mean))

    ref_masked = jnp.sum(seq * msk, axis=1) / jnp.sum(msk, axis=1)
    ref_mean = jnp.mean(seq, axis=1)

    assert out_masked.shape == (B, D)
    assert out_mean.shape == (B, D)
    assert jnp.allclose(out_masked, ref_masked, atol=1e-5, rtol=1e-5)
    assert jnp.allclose(out_mean, ref_mean, atol=1e-5, rtol=1e-5)

    print("KERNEL_OK")
</pallas_src>

<mosaic_0001>
module attributes {stable_mosaic.version = 11 : i64} {
  func.func @_masked_readout_kernel(%arg0: i32, %arg1: memref<2x8x32xf32, #tpu.memory_space<vmem>>, %arg2: memref<2x8x1xf32, #tpu.memory_space<vmem>>, %arg3: memref<2x32xf32, #tpu.memory_space<vmem>>, %arg4: memref<2x1xf32, #tpu.memory_space<vmem>>) attributes {dimension_semantics = [#tpu.dimension_semantics<arbitrary>], iteration_bounds = array<i64: 2>, scalar_prefetch = 0 : i64, scratch_operands = 1 : i64, tpu.core_type = #tpu.core_type<tc>, window_params = [{transform_indices = @transform_0, window_bounds = array<i64: 2, 8, 32>}, {transform_indices = @transform_1, window_bounds = array<i64: 2, 8, 1>}, {pipeline_mode = #tpu.pipeline_mode<synchronous>, transform_indices = @transform_2, window_bounds = array<i64: 2, 32>}]} {
    %c0_i32 = arith.constant 0 : i32
    %0 = arith.cmpi eq, %arg0, %c0_i32 : i32
    %1 = arith.extui %0 : i1 to i32
    %c0_i32_0 = arith.constant 0 : i32
    %2 = arith.cmpi ne, %1, %c0_i32_0 : i32
    scf.if %2 {
      %cst_16 = arith.constant 0.000000e+00 : f32
      %18 = vector.broadcast %cst_16 : f32 to vector<2x32xf32>
      %c0_17 = arith.constant 0 : index
      %c0_18 = arith.constant 0 : index
      %19 = vector.load %arg3[%c0_17, %c0_18] : memref<2x32xf32, #tpu.memory_space<vmem>>, vector<2x32xf32>
      tpu.vector_store %arg3[%c0_17, %c0_18], %18 {strides = array<i32>} : memref<2x32xf32, #tpu.memory_space<vmem>>, vector<2x32xf32>,
      %cst_19 = arith.constant 0.000000e+00 : f32
      %20 = vector.broadcast %cst_19 : f32 to vector<2x1xf32>
      %c0_20 = arith.constant 0 : index
      %c0_21 = arith.constant 0 : index
      %21 = vector.load %arg4[%c0_20, %c0_21] : memref<2x1xf32, #tpu.memory_space<vmem>>, vector<2x1xf32>
      tpu.vector_store %arg4[%c0_20, %c0_21], %20 {strides = array<i32>} : memref<2x1xf32, #tpu.memory_space<vmem>>, vector<2x1xf32>,
    } else {
    }
    %c0 = arith.constant 0 : index
    %c0_1 = arith.constant 0 : index
    %c0_2 = arith.constant 0 : index
    %3 = vector.load %arg1[%c0, %c0_1, %c0_2] : memref<2x8x32xf32, #tpu.memory_space<vmem>>, vector<2x8x32xf32>
    %c0_3 = arith.constant 0 : index
    %c0_4 = arith.constant 0 : index
    %c0_5 = arith.constant 0 : index
    %4 = vector.load %arg2[%c0_3, %c0_4, %c0_5] : memref<2x8x1xf32, #tpu.memory_space<vmem>>, vector<2x8x1xf32>
    %c0_6 = arith.constant 0 : index
    %c0_7 = arith.constant 0 : index
    %5 = vector.load %arg3[%c0_6, %c0_7] : memref<2x32xf32, #tpu.memory_space<vmem>>, vector<2x32xf32>
    %6 = vector.broadcast %4 : vector<2x8x1xf32> to vector<2x8x32xf32>
    %7 = arith.mulf %3, %6 : vector<2x8x32xf32>
    %cst = arith.constant dense<0.000000e+00> : vector<2x32xf32>
    %8 = vector.multi_reduction <add>, %7, %cst [1] : vector<2x8x32xf32> to vector<2x32xf32>
    %9 = arith.addf %5, %8 : vector<2x32xf32>
    %c0_8 = arith.constant 0 : index
    %c0_9 = arith.constant 0 : index
    %10 = vector.load %arg3[%c0_8, %c0_9] : memref<2x32xf32, #tpu.memory_space<vmem>>, vector<2x32xf32>
    tpu.vector_store %arg3[%c0_8, %c0_9], %9 {strides = array<i32>} : memref<2x32xf32, #tpu.memory_space<vmem>>, vector<2x32xf32>,
    %c0_10 = arith.constant 0 : index
    %c0_11 = arith.constant 0 : index
    %11 = vector.load %arg4[%c0_10, %c0_11] : memref<2x1xf32, #tpu.memory_space<vmem>>, vector<2x1xf32>
    %cst_12 = arith.constant dense<0.000000e+00> : vector<2x1xf32>
    %12 = vector.multi_reduction <add>, %4, %cst_12 [1] : vector<2x8x1xf32> to vector<2x1xf32>
    %13 = arith.addf %11, %12 : vector<2x1xf32>
    %c0_13 = arith.constant 0 : index
    %c0_14 = arith.constant 0 : index
    %14 = vector.load %arg4[%c0_13, %c0_14] : memref<2x1xf32, #tpu.memory_space<vmem>>, vector<2x1xf32>
    tpu.vector_store %arg4[%c0_13, %c0_14], %13 {strides = array<i32>} : memref<2x1xf32, #tpu.memory_space<vmem>>, vector<2x1xf32>,
    %c1_i32 = arith.constant 1 : i32
    %15 = arith.cmpi eq, %arg0, %c1_i32 : i32
    %16 = arith.extui %15 : i1 to i32
    %c0_i32_15 = arith.constant 0 : i32
    %17 = arith.cmpi ne, %16, %c0_i32_15 : i32
    scf.if %17 {
      %c0_16 = arith.constant 0 : index
      %c0_17 = arith.constant 0 : index
      %18 = vector.load %arg3[%c0_16, %c0_17] : memref<2x32xf32, #tpu.memory_space<vmem>>, vector<2x32xf32>
      %c0_18 = arith.constant 0 : index
      %c0_19 = arith.constant 0 : index
      %19 = vector.load %arg4[%c0_18, %c0_19] : memref<2x1xf32, #tpu.memory_space<vmem>>, vector<2x1xf32>
      %20 = vector.broadcast %19 : vector<2x1xf32> to vector<2x32xf32>
      %21 = arith.divf %18, %20 : vector<2x32xf32>
      %c0_20 = arith.constant 0 : index
      %c0_21 = arith.constant 0 : index
      %22 = vector.load %arg3[%c0_20, %c0_21] : memref<2x32xf32, #tpu.memory_space<vmem>>, vector<2x32xf32>
      tpu.vector_store %arg3[%c0_20, %c0_21], %21 {strides = array<i32>} : memref<2x32xf32, #tpu.memory_space<vmem>>, vector<2x32xf32>,
    } else {
    }
    return
  }
  func.func @transform_0(%arg0: i32) -> (i32, i32, i32) {
    %c0_i32 = arith.constant 0 : i32
    %c0_i32_0 = arith.constant 0 : i32
    %c0_i32_1 = arith.constant 0 : i32
    return %c0_i32, %arg0, %c0_i32_0 : i32, i32, i32
  }
  func.func @transform_1(%arg0: i32) -> (i32, i32, i32) {
    %c0_i32 = arith.constant 0 : i32
    %c0_i32_0 = arith.constant 0 : i32
    %c0_i32_1 = arith.constant 0 : i32
    return %c0_i32, %arg0, %c0_i32_0 : i32, i32, i32
  }
  func.func @transform_2(%arg0: i32) -> (i32, i32) {
    %c0_i32 = arith.constant 0 : i32
    %c0_i32_0 = arith.constant 0 : i32
    %c0_i32_1 = arith.constant 0 : i32
    return %c0_i32, %c0_i32_0 : i32, i32
  }
}

</mosaic_0001>

<bundles_post_ra>
// kernel: tpu_custom_call.1
= control target key start
LH: loop header
LB: loop body
LE: loop exit
PB: predicated region body
PF: predicated region fallthrough
CT: control target
= control target key end

     0   :  { %7 = vsyncpa [#allocation6], 0  ;;  %s508_s9 = smov 0   ;;  %s510_s10 = smov 0   ;;  %s594_s0 = inlined_call_operand.vmem [shape: f32[2,16,32], index: 0, kind: input, shape index: {}]   ;;  %s595_s1 = inlined_call_operand.vmem [shape: f32[2,16,1], index: 1, kind: input, shape index: {}]   ;;  %s596_s2 = inlined_call_operand.hbm [shape: f32[2,32], index: 2, kind: output, shape index: {}]  }
   0x1   :  { %s512_s11 = smov 0  }
   0x2 LB: > { %s524_s12 = sadd.s32 4294967295, %s487_s11   ;;  %s527_s13 = sadd.s32 1, %s487_s11   ;;  %s487_s11 = sphi %s512_s11, %s600_s11   ;;  %s483_s10 = sphi %s510_s10, %s599_s10   ;;  %s479_s9 = sphi %s508_s9, %s598_s9  }
   0x3   : > { %s17_s14 = ssub.s32 %s487_s11, %s527_s13  ;;  %s20_s15 = sadd.s32 1, %s483_s10 }
   0x4   : > { %p18_p0 = scmp.eq.s32.totalorder %s17_s14, 0  ;;  %p27_p1 = scmp.ne.s32.totalorder %s483_s10, %s479_s9 }
   0x5   : > { %p28_p2 = scmp.eq.s32.totalorder %s487_s11, 0  ;;  %p385_p4 = scmp.ge.s32.totalorder %s487_s11, 2 }
   0x6   : > { %s536_s16 = scalar_select %p18_p0, %s483_s10, %s20_s15  }
   0x7   : > { %p538_p3 = por %p28_p2, %p27_p1  ;;  %100 = sbr.rel (%p385_p4) target bundleno = 22 (0x16), region = 16 }
   0xc   : > { %103 = sbr.rel (!%p538_p3) target bundleno = 17 (0x11), region = 20  ;;  %s105_s18 = sand.u32 (%p538_p3), 1, %s483_s10  }
   0xd   : > { %s387_s19 = sshll.u32 (%p538_p3), %s487_s11, 3  ;;  %s386_s20 = sshll.u32 (%p538_p3), %s105_s18, 4 }
   0xe   : > { %s109_s23 = scalar_lea.vmem (%p538_p3), %s594_s0, %s387_s19  ;;  %s107_s24 = scalar_lea.vmem (%p538_p3), [#allocation3], %s386_s20 }
   0xf   : > { %v140_v0 = vld [vmem:[%s109_s23] sm:$0xff] (%p538_p3)  ;;  %v142_v1 = vld [vmem:[%s109_s23 + $0x10] sm:$0xff] (%p538_p3) }
  0x10   : > { %141 = vst [vmem:[%s107_s24] sm:$0xff] (%p538_p3), %v140_v0  ;;  %143 = vst [vmem:[%s107_s24 + $0x8] sm:$0xff] (%p538_p3), %v142_v1 }
  0x11 PF: > { %149 = sbr.rel (!%p538_p3) target bundleno = 22 (0x16), region = 58  ;;  %s151_s25 = sand.u32 (%p538_p3), 1, %s483_s10  }
  0x12   : > { %s389_s26 = sshll.u32 (%p538_p3), %s487_s11, 3  ;;  %s388_s27 = sshll.u32 (%p538_p3), %s151_s25, 4 }
  0x13   : > { %s155_s30 = scalar_lea.vmem (%p538_p3), %s595_s1, %s389_s26  ;;  %s153_s3 = scalar_lea.vmem (%p538_p3), [#allocation4], %s388_s27 }
  0x14   : > { %v186_v2 = vld [vmem:[%s155_s30] sm:$0xff] (%p538_p3)  ;;  %v188_v3 = vld [vmem:[%s155_s30 + $0x10] sm:$0xff] (%p538_p3) }
  0x15   : > { %187 = vst [vmem:[%s153_s3] sm:$0xff] (%p538_p3), %v186_v2  ;;  %189 = vst [vmem:[%s153_s3 + $0x8] sm:$0xff] (%p538_p3), %v188_v3 }
  0x16 PF: > { %p390_p5 = scmp.ge.s32.totalorder %s487_s11, 1  ;;  %p194_p6 = scmp.lt.s32.totalorder %s487_s11, 3 }
  0x18   : > { %p195_p7 = pnand %p390_p5, %p194_p6 }
  0x19   : > { %s201_s4 = sand.u32 (!%p195_p7), 1, %s479_s9   ;;  %p393_p8 = scmp.ne.s32.totalorder (!%p195_p7), %s524_s12, 0 }
  0x1a   : > { %198 = sbr.rel (%p195_p7) target bundleno = 346 (0x15a), region = 96  ;;  %s560_s5 = sshll.u32 (!%p195_p7), %s201_s4, 4 }
  0x1b   : > { %s203_s6 = scalar_lea.vmem (!%p195_p7), [#allocation3], %s560_s5  ;;  %s210_s7 = scalar_lea.vmem (!%p195_p7), [#allocation4], %s560_s5 }
  0x1f   : > { %231 = sbr.rel (%p393_p8) target bundleno = 39 (0x27), region = 108 }
  0x24   : > { %vm232_vm0 = vcmask 254976   ;;  %vm234_vm1 = vcmask 1024   ;;  %v489_v4 = vmov 0.0  }
  0x25   : > { %233 = vst.msk [vmem:[#allocation5] sm:$0x3] %vm232_vm0, %v489_v4 }
  0x26   : > { %235 = vst.msk [vmem:[#allocation2] sm:$0x3] %vm234_vm1, %v489_v4 }
  0x27 PF: > { %v238_v5 = vld [vmem:[%s210_s7] sm:$0xff]  ;;  %vm277_vm2 = vcmask 7168   ;;  %v239_v6 = vld [vmem:[%s210_s7 + $0x8] sm:$0xff]  ;;  %v490_v7 = vmov 0   ;;  %vm270_vm3 = vcmask 1041409   ;;  %vm297_vm4 = vcmask 1024  }
  0x28   : > { %433 = vset.pattern.permute.xlu0 %v490_v7  ;;  %v278_v8 = vsel %vm277_vm2, %v238_v5, 0.0  ;;  %v285_v9 = vsel %vm277_vm2, %v239_v6, 0.0  ;;  %v236_v25 = vld [vmem:[%s203_s6] sm:$0xff]  ;;  %vm253_vm5 = vcmask 261120   ;;  %v237_v28 = vld [vmem:[%s203_s6 + $0x8] sm:$0xff]  ;;  %vm274_vm6 = vcmask 254976  }
  0x29   : > { %243 = vperm.xlu0 %433, %v238_v5   ;;  %v279_v10 = vrot.slane %v278_v8, 4  ;;  %v286_v11 = vrot.slane %v285_v9, 4  ;;  %p394_p9 = scmp.ne.s32.totalorder %s524_s12, 1 }
  0x2b   : > { %v280_v12 = vadd.f32 %v279_v10, %v278_v8  ;;  %v287_v13 = vadd.f32 %v286_v11, %v285_v9 }
  0x2c   : > { %v240_v44 = vld [vmem:[#allocation5] sm:$0x3] }
  0x2d   : > { %v281_v14 = vrot.slane %v280_v12, 2  ;;  %v288_v15 = vrot.slane %v287_v13, 2  ;;  %248 = vperm.xlu0 %433, %v239_v6   ;;  %v276_v21 = vld [vmem:[#allocation2] sm:$0x3] }
  0x2f   : > { %v282_v16 = vadd.f32 %v281_v14, %v280_v12  ;;  %v289_v17 = vadd.f32 %v288_v15, %v287_v13 }
  0x31   : > { %v283_v18 = vrot.slane %v282_v16, 1  ;;  %v290_v19 = vrot.slane %v289_v17, 1 }
  0x33   : > { %v284_v20 = vadd.f32 %v283_v18, %v282_v16  ;;  %v291_v22 = vadd.f32 %v290_v19, %v289_v17 }
  0x35   : > { %v294_v23 = vsel %vm270_vm3, %v291_v22, %v284_v20 }
  0x36   : > { %v296_v24 = vadd.f32 %v294_v23, %v276_v21 }
  0x38   : > { %298 = vst.msk [vmem:[#allocation2] sm:$0x3] %vm297_vm4, %v296_v24 }
  0xa4   : > { %v244_v26 = vpop.permute.xlu0 %243 }
  0xa5   : > { %v251_v27 = vmul.f32 %v244_v26, %v236_v25 }
  0xa7   : > { %v254_v29 = vsel %vm253_vm5, %v251_v27, 0.0 }
  0xa8   : > { %v255_v30 = vrot.slane %v254_v29, 4  ;;  %v249_v31 = vpop.permute.xlu0 %248 }
  0xa9   : > { %v252_v32 = vmul.f32 %v249_v31, %v237_v28 }
  0xaa   : > { %v256_v33 = vadd.f32 %v255_v30, %v254_v29 }
  0xab   : > { %v261_v34 = vsel %vm253_vm5, %v252_v32, 0.0 }
  0xac   : > { %v257_v35 = vrot.slane %v256_v33, 2  ;;  %v262_v36 = vrot.slane %v261_v34, 4 }
  0xae   : > { %v258_v37 = vadd.f32 %v257_v35, %v256_v33  ;;  %v263_v38 = vadd.f32 %v262_v36, %v261_v34 }
  0xb0   : > { %v264_v39 = vrot.slane %v263_v38, 2  ;;  %v259_v40 = vrot.slane %v258_v37, 1 }
  0xb2   : > { %v265_v41 = vadd.f32 %v264_v39, %v263_v38  ;;  %v260_v43 = vadd.f32 %v259_v40, %v258_v37 }
  0xb4   : > { %v266_v42 = vrot.slane %v265_v41, 1 }
  0xb6   : > { %v267_v45 = vadd.f32 %v266_v42, %v265_v41 }
  0xb7   : > { %302 = sbr.rel (%p394_p9) target bundleno = 331 (0x14b), region = 112 }
  0xb8   : > { %v271_v46 = vsel %vm270_vm3, %v267_v45, %v260_v43 }
  0xb9   : > { %v273_v47 = vadd.f32 %v271_v46, %v240_v44 }
  0xbb   : > { %275 = vst.msk [vmem:[#allocation5] sm:$0x3] %vm274_vm6, %v273_v47 }
  0xbc   : > { %v304_v48 = vld [vmem:[#allocation2] sm:$0x3]  ;;  %v491_v49 = vmov 0  }
  0xbd   : > { %434 = vset.pattern.permute.xlu0 %v491_v49 }
  0xbe   : > { %307 = vperm.xlu0 %434, %v304_v48  }
  0xc2   : > { %v303_v51 = vld [vmem:[#allocation5] sm:$0x3] }
 0x139   : > { %v308_v50 = vpop.permute.xlu0 %307 }
 0x13a   : > { %435 = vrcp.f32 %v308_v50 }
 0x147   : > { %v436_v52 = vpop.eup %435 }
 0x148   : > { %v311_v53 = vmul.f32 %v436_v52, %v303_v51 }
 0x14a   : > { %312 = vst.msk [vmem:[#allocation5] sm:$0x3] %vm274_vm6, %v311_v53 }
 0x14b PF: > { %p403_p10 = scmp.eq.s32.totalorder %s524_s12, 1  ;;  %s492_s8 = smov [#allocation5]  }
 0x14c   : > { %s320_s9 = sshll.u32 %s492_s8, 4  ;;  %s321_s9 = int_to_ptr.vmem [resolvable:$true] %s320_s9 }
 0x14d   : > { %s437_s11 = scalar_lea.vmem %s321_s9, 32  ;;  %p444_p0 = scmp.lt.s32.totalorder %s321_s9, %s321_s9 }
 0x14e   : > { %p438_p11 = scmp.ne.s32.totalorder %s321_s9, %s437_s11  ;;  %p445_p1 = scmp.lt.s32.totalorder %s437_s11, %s437_s11 }
 0x150   : > { %p439_p12 = pnand %p438_p11, %p403_p10  ;;  %p446_p2 = por %p445_p1, %p444_p0 }
 0x152   : > { %p440_p13 = pneg %p439_p12 }
 0x154   : > { %p447_p3 = pnand %p446_p2, %p440_p13 }
 0x156   : > { %450 = shalt.err (!%p447_p3)
}
 0x157   : > { %400 = dma.vmem_to_hbm [thread:$0]  (%p403_p10), %s321_s9, 32, %s596_s2, [#allocation6]  }
 0x158   : > { %474 = dma.done.wait (%p403_p10), [#allocation6], 32  }
 0x159   : > { %476 = vsyncadd (%p403_p10), [#allocation6], 4294967264 }
 0x15a PF: > { %p10_p4 = scmp.ge.s32.totalorder %s527_s13, 4   ;;  %s598_s9 = smov %s483_s10 }
 0x15b   : > { %s599_s10 = smov %s536_s16  ;;  %s600_s11 = smov %s527_s13 }
 0x15c   :  { %12 = sbr.rel (!%p10_p4) target bundleno = 2 (0x2), region = 152 }
 0x161   :  { %333 = vsyncpa [#allocation6], 1 }
 0x162   :  { %335 = vsyncpa [#allocation6 + $0x1], 1 }

</bundles_post_ra>
